<compile_context>
chip_gen: v6e
topology: v6e:2x2x1
jax: 0.10.0
libtpu: 0.0.40
codegen_flags: <defaults>
</compile_context>

<pallas_src>
import functools

import jax
import jax.numpy as jnp
from jax.experimental import pallas as pl
from jax.experimental.pallas import tpu as pltpu


def _ce_kernel(logits_ref, label_ref, out_ref, loss_acc, corr_acc, *,
               n_total, loss_weight):
    i = pl.program_id(0)

    @pl.when(i == 0)
    def _init():
        loss_acc[...] = jnp.zeros_like(loss_acc)
        corr_acc[...] = jnp.zeros_like(corr_acc)

    logits = logits_ref[...].astype(jnp.float32)          # (TN, C)
    labels = label_ref[...]                                # (TN, 1) int32
    tn, c = logits.shape

    col = jax.lax.broadcasted_iota(jnp.int32, (tn, c), 1)  # class index per lane

    # Mask for rows that actually exist (final tile may be padded).
    row = jax.lax.broadcasted_iota(jnp.int32, (tn, 1), 0) + i * tn
    valid = row < n_total                                  # (TN, 1) bool

    # Row max — shared by the softmax and the top-1 argmax (single XLU reduce).
    m = jnp.max(logits, axis=-1, keepdims=True)            # (TN, 1)
    shifted = logits - m
    lse = jnp.log(jnp.sum(jnp.exp(shifted), axis=-1, keepdims=True))  # (TN, 1)

    # -log p[label] without materializing full log-probs:
    #   loss_row = lse - shifted[label]
    pick_mask = (col == labels)                            # (TN, C) bool
    picked_shifted = jnp.sum(jnp.where(pick_mask, shifted, 0.0),
                             axis=-1, keepdims=True)       # (TN, 1)
    loss_rows = jnp.where(valid, lse - picked_shifted, 0.0)

    # Top-1 prediction: first column reaching the row max (reuses m).
    pred_idx = jnp.min(jnp.where(logits >= m, col, c),
                       axis=-1, keepdims=True)             # (TN, 1) int32
    correct = jnp.where(valid & (pred_idx == labels), 1.0, 0.0)

    loss_acc[...] += jnp.sum(loss_rows, axis=0, keepdims=True)
    corr_acc[...] += jnp.sum(correct, axis=0, keepdims=True)

    @pl.when(i == pl.num_programs(0) - 1)
    def _finalize():
        inv_n = 1.0 / jnp.float32(n_total)
        loss_val = loss_acc[...] * (jnp.float32(loss_weight) * inv_n)   # (1, 1)
        top1_val = corr_acc[...] * (100.0 * inv_n)                      # (1, 1)
        lane = jax.lax.broadcasted_iota(jnp.int32, (1, 2), 1)
        out_ref[...] = jnp.where(lane == 0, loss_val, top1_val)         # (1, 2)


def _choose_tile_rows(n, c, itemsize, target_bytes=2 * 1024 * 1024):
    """Biggest row-tile (multiple of 8) whose logits slab stays <= target_bytes."""
    rows = (target_bytes // max(1, c * itemsize)) // 8 * 8
    rows = max(8, int(rows))
    if rows >= n:
        return n
    return rows


def ce_loss_forward(logits, label, loss_weight=1.0, modality='text',
                    tile_rows=None):
    """Pallas equivalent of CELoss.forward.

    logits: (N, C), any float dtype (bf16/f32 fine; cast happens in-kernel).
    label : (N,) integer class ids, or (N, C) soft/one-hot scores
            (argmax over dim=1 is taken, matching the PyTorch branch).
    """
    n, c = logits.shape
    if label.ndim > 1:
        label = jnp.argmax(label, axis=1)
    label = label.astype(jnp.int32).reshape(n, 1)

    if tile_rows is None:
        tn = _choose_tile_rows(n, c, jnp.dtype(logits.dtype).itemsize)
    else:
        tn = int(tile_rows)

    kernel = functools.partial(_ce_kernel, n_total=n,
                               loss_weight=float(loss_weight))
    out = pl.pallas_call(
        kernel,
        out_shape=jax.ShapeDtypeStruct((1, 2), jnp.float32),
        grid_spec=pltpu.PrefetchScalarGridSpec(
            num_scalar_prefetch=0,
            grid=(pl.cdiv(n, tn),),
            in_specs=[
                pl.BlockSpec((tn, c), lambda i: (i, 0)),   # logits tile
                pl.BlockSpec((tn, 1), lambda i: (i, 0)),   # int32 labels tile
            ],
            out_specs=pl.BlockSpec((1, 2), lambda i: (0, 0)),
            scratch_shapes=[
                pltpu.VMEM((1, 1), jnp.float32),   # running sum of -log p[label]
                pltpu.VMEM((1, 1), jnp.float32),   # running count of correct top-1
            ],
        ),
        compiler_params=pltpu.CompilerParams(
            dimension_semantics=("arbitrary",),    # reduction axis carries accumulator
            vmem_limit_bytes=32 * 1024 * 1024,
        ),
    )(logits, label)
    return {f'loss_{modality}_CE': out[0, 0], 'top1': out[0, 1]}


if __name__ == "__main__":
    key = jax.random.PRNGKey(0)
    k1, k2, k3, k4 = jax.random.split(key, 4)

    # --- Test 1: f32 logits, one-hot (soft) labels, single tile ---------------
    N, C = 16, 32
    logits = jax.random.normal(k1, (N, C), dtype=jnp.float32)
    label_int = jax.random.randint(k2, (N,), 0, C)
    label_onehot = jax.nn.one_hot(label_int, C, dtype=jnp.float32)

    out = ce_loss_forward(logits, label_onehot, loss_weight=0.5, modality='text')
    out = jax.tree_util.tree_map(jax.block_until_ready, out)

    logp_ref = jax.nn.log_softmax(logits, axis=-1)
    loss_ref = 0.5 * (-jnp.mean(logp_ref[jnp.arange(N), label_int]))
    top1_ref = 100.0 * jnp.mean(
        (jnp.argmax(logits, axis=-1) == label_int).astype(jnp.float32))
    assert jnp.allclose(out['loss_text_CE'], loss_ref, atol=1e-5), (
        out['loss_text_CE'], loss_ref)
    assert jnp.allclose(out['top1'], top1_ref, atol=1e-4), (out['top1'], top1_ref)

    # --- Test 2: bf16 logits, int labels, multi-tile grid with padded tail ----
    N2, C2 = 20, 128
    logits2 = jax.random.normal(k3, (N2, C2), dtype=jnp.bfloat16)
    labels2 = jax.random.randint(k4, (N2,), 0, C2)

    out2 = ce_loss_forward(logits2, labels2, loss_weight=1.0,
                           modality='skeleton', tile_rows=8)
    out2 = jax.tree_util.tree_map(jax.block_until_ready, out2)

    logits2_f32 = logits2.astype(jnp.float32)
    logp2_ref = jax.nn.log_softmax(logits2_f32, axis=-1)
    loss2_ref = -jnp.mean(logp2_ref[jnp.arange(N2), labels2])
    top12_ref = 100.0 * jnp.mean(
        (jnp.argmax(logits2_f32, axis=-1) == labels2).astype(jnp.float32))
    assert jnp.allclose(out2['loss_skeleton_CE'], loss2_ref, atol=1e-4), (
        out2['loss_skeleton_CE'], loss2_ref)
    assert jnp.allclose(out2['top1'], top12_ref, atol=1e-3), (
        out2['top1'], top12_ref)

    print("KERNEL_OK")
</pallas_src>

<mosaic_0001>
module attributes {stable_mosaic.version = 11 : i64} {
  func.func @_ce_kernel(%arg0: i32, %arg1: memref<16x32xf32, #tpu.memory_space<vmem>>, %arg2: memref<16x1xi32, #tpu.memory_space<vmem>>, %arg3: memref<1x2xf32, #tpu.memory_space<vmem>>, %arg4: memref<1x1xf32, #tpu.memory_space<vmem>>, %arg5: memref<1x1xf32, #tpu.memory_space<vmem>>) attributes {dimension_semantics = [#tpu.dimension_semantics<arbitrary>], iteration_bounds = array<i64: 1>, scalar_prefetch = 0 : i64, scratch_operands = 2 : i64, tpu.core_type = #tpu.core_type<tc>, window_params = [{transform_indices = @transform_0, window_bounds = array<i64: 16, 32>}, {transform_indices = @transform_1, window_bounds = array<i64: 16, 1>}, {pipeline_mode = #tpu.pipeline_mode<synchronous>, transform_indices = @transform_2, window_bounds = array<i64: 1, 2>}]} {
    %c0_i32 = arith.constant 0 : i32
    %0 = arith.cmpi eq, %arg0, %c0_i32 : i32
    %1 = arith.extui %0 : i1 to i32
    %c0_i32_0 = arith.constant 0 : i32
    %2 = arith.cmpi ne, %1, %c0_i32_0 : i32
    scf.if %2 {
      %cst_24 = arith.constant 0.000000e+00 : f32
      %53 = vector.broadcast %cst_24 : f32 to vector<1x1xf32>
      %c0_25 = arith.constant 0 : index
      %c0_26 = arith.constant 0 : index
      %54 = vector.load %arg4[%c0_25, %c0_26] : memref<1x1xf32, #tpu.memory_space<vmem>>, vector<1x1xf32>
      tpu.vector_store %arg4[%c0_25, %c0_26], %53 {strides = array<i32>} : memref<1x1xf32, #tpu.memory_space<vmem>>, vector<1x1xf32>,
      %cst_27 = arith.constant 0.000000e+00 : f32
      %55 = vector.broadcast %cst_27 : f32 to vector<1x1xf32>
      %c0_28 = arith.constant 0 : index
      %c0_29 = arith.constant 0 : index
      %56 = vector.load %arg5[%c0_28, %c0_29] : memref<1x1xf32, #tpu.memory_space<vmem>>, vector<1x1xf32>
      tpu.vector_store %arg5[%c0_28, %c0_29], %55 {strides = array<i32>} : memref<1x1xf32, #tpu.memory_space<vmem>>, vector<1x1xf32>,
    } else {
    }
    %c0 = arith.constant 0 : index
    %c0_1 = arith.constant 0 : index
    %3 = vector.load %arg1[%c0, %c0_1] : memref<16x32xf32, #tpu.memory_space<vmem>>, vector<16x32xf32>
    %c0_2 = arith.constant 0 : index
    %c0_3 = arith.constant 0 : index
    %4 = vector.load %arg2[%c0_2, %c0_3] : memref<16x1xi32, #tpu.memory_space<vmem>>, vector<16x1xi32>
    %5 = tpu.iota {dimensions = array<i32: 1>} : vector<16x32xi32>
    %6 = tpu.iota {dimensions = array<i32: 0>} : vector<16x1xi32>
    %c16_i32 = arith.constant 16 : i32
    %7 = arith.muli %arg0, %c16_i32 : i32
    %8 = vector.broadcast %7 : i32 to vector<16x1xi32>
    %9 = arith.addi %6, %8 : vector<16x1xi32>
    %c16_i32_4 = arith.constant 16 : i32
    %10 = vector.broadcast %c16_i32_4 : i32 to vector<16x1xi32>
    %11 = arith.cmpi slt, %9, %10 : vector<16x1xi32>
    %cst = arith.constant dense<0xFF800000> : vector<16xf32>
    %12 = vector.multi_reduction <maximumf>, %3, %cst [1] : vector<16x32xf32> to vector<16xf32>
    %13 = vector.shape_cast %12 : vector<16xf32> to vector<16x1xf32>
    %14 = vector.broadcast %13 : vector<16x1xf32> to vector<16x32xf32>
    %15 = arith.subf %3, %14 : vector<16x32xf32>
    %16 = math.exp %15 : vector<16x32xf32>
    %cst_5 = arith.constant dense<0.000000e+00> : vector<16xf32>
    %17 = vector.multi_reduction <add>, %16, %cst_5 [1] : vector<16x32xf32> to vector<16xf32>
    %18 = vector.shape_cast %17 : vector<16xf32> to vector<16x1xf32>
    %19 = math.log %18 : vector<16x1xf32>
    %20 = vector.broadcast %4 : vector<16x1xi32> to vector<16x32xi32>
    %21 = arith.cmpi eq, %5, %20 : vector<16x32xi32>
    %cst_6 = arith.constant 0.000000e+00 : f32
    %22 = vector.broadcast %cst_6 : f32 to vector<16x32xf32>
    %23 = arith.select %21, %15, %22 : vector<16x32xi1>, vector<16x32xf32>
    %cst_7 = arith.constant dense<0.000000e+00> : vector<16xf32>
    %24 = vector.multi_reduction <add>, %23, %cst_7 [1] : vector<16x32xf32> to vector<16xf32>
    %25 = vector.shape_cast %24 : vector<16xf32> to vector<16x1xf32>
    %26 = arith.subf %19, %25 : vector<16x1xf32>
    %cst_8 = arith.constant 0.000000e+00 : f32
    %27 = vector.broadcast %cst_8 : f32 to vector<16x1xf32>
    %28 = arith.select %11, %26, %27 : vector<16x1xi1>, vector<16x1xf32>
    %29 = vector.broadcast %13 : vector<16x1xf32> to vector<16x32xf32>
    %30 = arith.cmpf oge, %3, %29 : vector<16x32xf32>
    %c32_i32 = arith.constant 32 : i32
    %31 = vector.broadcast %c32_i32 : i32 to vector<16x32xi32>
    %32 = arith.select %30, %5, %31 : vector<16x32xi1>, vector<16x32xi32>
    %cst_9 = arith.constant dense<2147483647> : vector<16xi32>
    %33 = vector.multi_reduction <minsi>, %32, %cst_9 [1] : vector<16x32xi32> to vector<16xi32>
    %34 = vector.shape_cast %33 : vector<16xi32> to vector<16x1xi32>
    %35 = arith.cmpi eq, %34, %4 : vector<16x1xi32>
    %36 = arith.andi %11, %35 : vector<16x1xi1>
    %cst_10 = arith.constant 1.000000e+00 : f32
    %cst_11 = arith.constant 0.000000e+00 : f32
    %37 = vector.broadcast %cst_10 : f32 to vector<16x1xf32>
    %38 = vector.broadcast %cst_11 : f32 to vector<16x1xf32>
    %39 = arith.select %36, %37, %38 : vector<16x1xi1>, vector<16x1xf32>
    %c0_12 = arith.constant 0 : index
    %c0_13 = arith.constant 0 : index
    %40 = vector.load %arg4[%c0_12, %c0_13] : memref<1x1xf32, #tpu.memory_space<vmem>>, vector<1x1xf32>
    %cst_14 = arith.constant dense<0.000000e+00> : vector<1xf32>
    %41 = vector.multi_reduction <add>, %28, %cst_14 [0] : vector<16x1xf32> to vector<1xf32>
    %42 = vector.shape_cast %41 : vector<1xf32> to vector<1x1xf32>
    %43 = arith.addf %40, %42 : vector<1x1xf32>
    %c0_15 = arith.constant 0 : index
    %c0_16 = arith.constant 0 : index
    %44 = vector.load %arg4[%c0_15, %c0_16] : memref<1x1xf32, #tpu.memory_space<vmem>>, vector<1x1xf32>
    tpu.vector_store %arg4[%c0_15, %c0_16], %43 {strides = array<i32>} : memref<1x1xf32, #tpu.memory_space<vmem>>, vector<1x1xf32>,
    %c0_17 = arith.constant 0 : index
    %c0_18 = arith.constant 0 : index
    %45 = vector.load %arg5[%c0_17, %c0_18] : memref<1x1xf32, #tpu.memory_space<vmem>>, vector<1x1xf32>
    %cst_19 = arith.constant dense<0.000000e+00> : vector<1xf32>
    %46 = vector.multi_reduction <add>, %39, %cst_19 [0] : vector<16x1xf32> to vector<1xf32>
    %47 = vector.shape_cast %46 : vector<1xf32> to vector<1x1xf32>
    %48 = arith.addf %45, %47 : vector<1x1xf32>
    %c0_20 = arith.constant 0 : index
    %c0_21 = arith.constant 0 : index
    %49 = vector.load %arg5[%c0_20, %c0_21] : memref<1x1xf32, #tpu.memory_space<vmem>>, vector<1x1xf32>
    tpu.vector_store %arg5[%c0_20, %c0_21], %48 {strides = array<i32>} : memref<1x1xf32, #tpu.memory_space<vmem>>, vector<1x1xf32>,
    %c0_i32_22 = arith.constant 0 : i32
    %50 = arith.cmpi eq, %arg0, %c0_i32_22 : i32
    %51 = arith.extui %50 : i1 to i32
    %c0_i32_23 = arith.constant 0 : i32
    %52 = arith.cmpi ne, %51, %c0_i32_23 : i32
    scf.if %52 {
      %cst_24 = arith.constant 1.000000e+00 : f32
      %cst_25 = arith.constant 1.600000e+01 : f32
      %53 = arith.divf %cst_24, %cst_25 : f32
      %c0_26 = arith.constant 0 : index
      %c0_27 = arith.constant 0 : index
      %54 = vector.load %arg4[%c0_26, %c0_27] : memref<1x1xf32, #tpu.memory_space<vmem>>, vector<1x1xf32>
      %cst_28 = arith.constant 5.000000e-01 : f32
      %55 = arith.mulf %cst_28, %53 : f32
      %56 = vector.broadcast %55 : f32 to vector<1x1xf32>
      %57 = arith.mulf %54, %56 : vector<1x1xf32>
      %c0_29 = arith.constant 0 : index
      %c0_30 = arith.constant 0 : index
      %58 = vector.load %arg5[%c0_29, %c0_30] : memref<1x1xf32, #tpu.memory_space<vmem>>, vector<1x1xf32>
      %cst_31 = arith.constant 1.000000e+02 : f32
      %59 = arith.mulf %cst_31, %53 : f32
      %60 = vector.broadcast %59 : f32 to vector<1x1xf32>
      %61 = arith.mulf %58, %60 : vector<1x1xf32>
      %62 = tpu.iota {dimensions = array<i32: 1>} : vector<1x2xi32>
      %c0_i32_32 = arith.constant 0 : i32
      %63 = vector.broadcast %c0_i32_32 : i32 to vector<1x2xi32>
      %64 = arith.cmpi eq, %62, %63 : vector<1x2xi32>
      %65 = vector.shape_cast %57 : vector<1x1xf32> to vector<1x1xf32>
      %66 = vector.broadcast %65 : vector<1x1xf32> to vector<1x2xf32>
      %67 = vector.shape_cast %61 : vector<1x1xf32> to vector<1x1xf32>
      %68 = vector.broadcast %67 : vector<1x1xf32> to vector<1x2xf32>
      %69 = arith.select %64, %66, %68 : vector<1x2xi1>, vector<1x2xf32>
      %c0_33 = arith.constant 0 : index
      %c0_34 = arith.constant 0 : index
      %70 = vector.load %arg3[%c0_33, %c0_34] : memref<1x2xf32, #tpu.memory_space<vmem>>, vector<1x2xf32>
      tpu.vector_store %arg3[%c0_33, %c0_34], %69 {strides = array<i32>} : memref<1x2xf32, #tpu.memory_space<vmem>>, vector<1x2xf32>,
    } else {
    }
    return
  }
  func.func @transform_0(%arg0: i32) -> (i32, i32) {
    %c0_i32 = arith.constant 0 : i32
    %c0_i32_0 = arith.constant 0 : i32
    return %arg0, %c0_i32 : i32, i32
  }
  func.func @transform_1(%arg0: i32) -> (i32, i32) {
    %c0_i32 = arith.constant 0 : i32
    %c0_i32_0 = arith.constant 0 : i32
    return %arg0, %c0_i32 : i32, i32
  }
  func.func @transform_2(%arg0: i32) -> (i32, i32) {
    %c0_i32 = arith.constant 0 : i32
    %c0_i32_0 = arith.constant 0 : i32
    %c0_i32_1 = arith.constant 0 : i32
    return %c0_i32, %c0_i32_0 : i32, i32
  }
}

</mosaic_0001>

<bundles_post_ra>
// kernel: tpu_custom_call.1
= control target key start
LH: loop header
LB: loop body
LE: loop exit
PB: predicated region body
PF: predicated region fallthrough
CT: control target
= control target key end

     0   :  { %vm34_vm0 = vcmask 261120   ;;  %v219_v3 = vmov 0   ;;  %s277_s0 = inlined_call_operand.vmem [shape: f32[16,32], index: 0, kind: input, shape index: {}]   ;;  %s278_s1 = inlined_call_operand.vmem [shape: s32[16,1], index: 1, kind: input, shape index: {}]   ;;  %s279_s2 = inlined_call_operand.hbm [shape: f32[1,2], index: 2, kind: output, shape index: {}]  }
   0x1   :  { %v19_v0 = vld [vmem:[%s277_s0] sm:$0xff]  ;;  %v20_v1 = vld [vmem:[%s277_s0 + $0x8] sm:$0xff]  ;;  %187 = vset.pattern.permute.xlu0 %v219_v3  ;;  %188 = vset.pattern.permute.xlu1 %v219_v3 }
   0x2   :  { %v35_v2 = vsel %vm34_vm0, %v19_v0, -inf }
   0x3   :  { %7 = vsyncpa [#allocation5], 0  ;;  %36 = vmax.xlane.f32.xlu0 %v35_v2  ;;  %v38_v4 = vsel %vm34_vm0, %v20_v1, -inf  ;;  %v248_v5 = vld [vmem:[%s278_s1] sm:$0xff]  ;;  %v23_v6 = vlaneseq  ;;  %v22_v22 = vld [vmem:[%s278_s1 + $0x8] sm:$0xff]  ;;  %vm16_vm7 = vcmask 0  }
   0x4   :  { %v220_v40 = vmov 0.0   ;;  %vm129_vm9 = vcmask 7168   ;;  %s221_s1 = smov [#allocation4]   ;;  %vm168_vm12 = vcmask 8192  }
   0x5   :  { %v252_v7 = vand.u32 127, %v23_v6  ;;  %17 = vst.msk [vmem:[#allocation2] sm:$0x1] %vm16_vm7, %v220_v40  ;;  %18 = vst.msk [vmem:[#allocation3] sm:$0x1] %vm16_vm7, %v220_v40  ;;  %s176_s16 = sshll.u32 %s221_s1, 4  ;;  %s177_s16 = int_to_ptr.vmem [resolvable:$true] %s176_s16 }
   0x6   :  { %s197_s17 = scalar_lea.vmem %s177_s16, 16  ;;  %s201_s18 = scalar_lea.vmem %s177_s16, 32 }
   0x7   :  { %39 = vmax.xlane.f32.xlu0 %v38_v4  ;;  %vm148_vm11 = vcmp.eq.s32.totalorder %v252_v7, 0  ;;  %p198_p0 = scmp.ne.s32.totalorder %s177_s16, %s197_s17  ;;  %p202_p1 = scmp.lt.s32.totalorder %s177_s16, %s177_s16 }
   0x8   :  { %p203_p2 = scmp.lt.s32.totalorder %s201_s18, %s197_s17 }
   0xa   :  { %p204_p3 = por %p203_p2, %p202_p1 }
   0xc   :  { %p205_p4 = pnand %p204_p3, %p198_p0 }
  0x1d   :  { %58 = vperm.xlu0 %187, %v248_v5  }
  0x8c   :  { %v37_v8 = vpop.xlane.xlu0 %36 }
  0x8d   :  { %vm77_vm1 = vcmp.ge.f32.partialorder %v19_v0, %v37_v8  ;;  %v41_v23 = vsub.f32 %v19_v0, %v37_v8 }
  0x8e   :  { %v79_v9 = vsel %vm77_vm1, %v252_v7, 32 }
  0x8f   :  { %v81_v10 = vsel %vm34_vm0, %v79_v9, 2147483647  ;;  %v43_v24 = vmul.f32 1.442695, %v41_v23 }
  0x90   :  { %v40_v11 = vpop.xlane.xlu0 %39  ;;  %v83_v12 = vshra.s32 %v81_v10, 16  ;;  %v82_v27 = vand.u32 65535, %v81_v10 }
  0x91   :  { %v42_v13 = vsub.f32 %v20_v1, %v40_v11  ;;  %vm78_vm2 = vcmp.ge.f32.partialorder %v20_v1, %v40_v11 }
  0x92   :  { %v80_v14 = vsel %vm78_vm2, %v252_v7, 32  ;;  %v85_v15 = vcvt.s32.f32 %v83_v12  ;;  %v84_v29 = vcvt.s32.f32 %v82_v27 }
  0x93   :  { %v45_v16 = vmul.f32 1.442695, %v42_v13  ;;  %v96_v17 = vsel %vm34_vm0, %v80_v14, 2147483647  ;;  %v128_v14 = vld [vmem:[#allocation3] sm:$0x1] }
  0x94   :  { %86 = vmin.xlane.f32.xlu1 %v85_v15  ;;  %v98_v18 = vshra.s32 %v96_v17, 16  ;;  %v97_v30 = vand.u32 65535, %v96_v17 }
  0x95   :  { %189 = vpow2.f32 %v45_v16 }
  0x96   :  { %v100_v19 = vcvt.s32.f32 %v98_v18  ;;  %191 = vpow2.f32 %v43_v24  ;;  %v99_v34 = vcvt.s32.f32 %v97_v30 }
  0x98   :  { %101 = vmin.xlane.f32.xlu1 %v100_v19  ;;  %v59_v31 = vpop.permute.xlu0 %58 }
  0x99   :  { %vm63_vm4 = vcmp.eq.s32.totalorder %v252_v7, %v59_v31 }
  0x9a   :  { %v65_v36 = vsel %vm63_vm4, %v41_v23, 0.0 }
  0x9b   :  { %v67_v38 = vsel %vm34_vm0, %v65_v36, 0.0 }
  0xa2   :  { %v190_v20 = vpop.eup %189 }
  0xa3   :  { %v50_v21 = vsel %vm34_vm0, %v190_v20, 0.0  ;;  %v192_v25 = vpop.eup %191 }
  0xa4   :  { %51 = vadd.xlane.f32.xlu0 %v50_v21  ;;  %v47_v26 = vsel %vm34_vm0, %v192_v25, 0.0 }
  0xa9   :  { %61 = vperm.xlu1 %188, %v22_v22  }
  0xcd   :  { %48 = vadd.xlane.f32.xlu1 %v47_v26  ;;  %v155_v26 = vshrl.u32 %v23_v6, 7 }
  0xcf   :  { %v156_v27 = vsub.s32 0, %v155_v26 }
 0x11d   :  { %v87_v28 = vpop.xlane.xlu1 %86 }
 0x11e   :  { %vm88_vm3 = vcmp.eq.f32.partialorder %v85_v15, %v87_v28  ;;  %v93_v44 = vcvt.f32.s32 %v87_v28 }
 0x11f   :  { %v89_v32 = vsel %vm88_vm3, %v84_v29, inf }
 0x120   :  { %90 = vmin.xlane.f32.xlu1 %v89_v32  ;;  %v94_v46 = vshll.u32 %v93_v44, 16 }
 0x121   :  { %v102_v33 = vpop.xlane.xlu1 %101 }
 0x122   :  { %vm103_vm5 = vcmp.eq.f32.partialorder %v100_v19, %v102_v33  ;;  %v108_v47 = vcvt.f32.s32 %v102_v33  ;;  %v117_v19 = vld [vmem:[#allocation2] sm:$0x1] }
 0x123   :  { %v104_v35 = vsel %vm103_vm5, %v99_v34, inf }
 0x124   :  { %105 = vmin.xlane.f32.xlu1 %v104_v35  ;;  %v109_v51 = vshll.u32 %v108_v47, 16 }
 0x125   :  { %v62_v37 = vpop.permute.xlu1 %61 }
 0x126   :  { %vm64_vm6 = vcmp.eq.s32.totalorder %v252_v7, %v62_v37 }
 0x127   :  { %v66_v39 = vsel %vm64_vm6, %v42_v13, 0.0 }
 0x128   :  { %68 = vadd.xlane.f32.xlu1 %v67_v38  ;;  %v70_v41 = vsel %vm34_vm0, %v66_v39, 0.0 }
 0x12c   :  { %71 = vadd.xlane.f32.xlu1 %v70_v41 }
 0x12d   :  { %v52_v42 = vpop.xlane.xlu0 %51 }
 0x12e   :  { %193 = vlog2.f32 %v52_v42 }
 0x13b   :  { %v194_v53 = vpop.eup %193 }
 0x13c   :  { %v56_v62 = vmul.f32 0.6931472, %v194_v53 }
 0x156   :  { %v49_v43 = vpop.xlane.xlu1 %48 }
 0x157   :  { %195 = vlog2.f32 %v49_v43 }
 0x164   :  { %v196_v55 = vpop.eup %195 }
 0x165   :  { %v54_v61 = vmul.f32 0.6931472, %v196_v55 }
 0x1a9   :  { %v91_v45 = vpop.xlane.xlu1 %90 }
 0x1aa   :  { %v92_v48 = vcvt.f32.s32 %v91_v45 }
 0x1ac   :  { %v95_v49 = vadd.s32 %v94_v46, %v92_v48 }
 0x1ad   :  { %v106_v50 = vpop.xlane.xlu1 %105 }
 0x1ae   :  { %vm111_vm8 = vcmp.eq.s32.totalorder %v95_v49, %v248_v5  ;;  %v107_v52 = vcvt.f32.s32 %v106_v50 }
 0x1af   :  { %v115_v56 = vsel %vm111_vm8, 1.0, %v220_v40 }
 0x1b0   :  { %v110_v54 = vadd.s32 %v109_v51, %v107_v52  ;;  %v130_v59 = vsel %vm129_vm9, %v115_v56, 0.0 }
 0x1b1   :  { %v69_v57 = vpop.xlane.xlu1 %68 }
 0x1b2   :  { %vm112_vm10 = vcmp.eq.s32.totalorder %v110_v54, %v22_v22  ;;  %v73_v1 = vsub.f32 %v54_v61, %v69_v57 }
 0x1b3   :  { %v116_v58 = vsel %vm112_vm10, 1.0, %v220_v40 }
 0x1b4   :  { %v131_v60 = vsel %vm129_vm9, %v116_v58, 0.0 }
 0x1b5   :  { %v132_v63 = vadd.f32 %v131_v60, %v130_v59  ;;  %v72_v0 = vpop.xlane.xlu1 %71 }
 0x1b6   :  { %v74_v2 = vsub.f32 %v56_v62, %v72_v0 }
 0x1b7   :  { %v133_v3 = vrot.slane %v132_v63, 4 }
 0x1b8   :  { %v118_v4 = vadd.f32 %v74_v2, %v73_v1 }
 0x1b9   :  { %v134_v5 = vadd.f32 %v133_v3, %v132_v63 }
 0x1ba   :  { %v119_v8 = vrot.slane %v118_v4, 4 }
 0x1bb   :  { %v135_v9 = vrot.slane %v134_v5, 2 }
 0x1bc   :  { %v120_v10 = vadd.f32 %v119_v8, %v118_v4 }
 0x1bd   :  { %v136_v11 = vadd.f32 %v135_v9, %v134_v5 }
 0x1be   :  { %v121_v12 = vrot.slane %v120_v10, 2 }
 0x1bf   :  { %v137_v13 = vrot.slane %v136_v11, 1 }
 0x1c0   :  { %v122_v15 = vadd.f32 %v121_v12, %v120_v10 }
 0x1c1   :  { %v138_v16 = vadd.f32 %v137_v13, %v136_v11 }
 0x1c2   :  { %v123_v17 = vrot.slane %v122_v15, 1 }
 0x1c3   :  { %v139_v18 = vadd.f32 %v138_v16, %v128_v14 }
 0x1c4   :  { %v124_v20 = vadd.f32 %v123_v17, %v122_v15 }
 0x1c5   :  { %140 = vst.msk [vmem:[#allocation3] sm:$0x1] %vm16_vm7, %v139_v18 }
 0x1c6   :  { %v125_v21 = vadd.f32 %v124_v20, %v117_v19 }
 0x1c8   :  { %127 = vst.msk [vmem:[#allocation2] sm:$0x1] %vm16_vm7, %v125_v21 }
 0x1cc   :  { %v146_v22 = vld [vmem:[#allocation3] sm:$0x1] }
 0x1cd   :  { %v147_v23 = vmul.f32 6.25, %v146_v22 }
 0x1cf   :  { %160 = vperm.xlu0 %187, %v147_v23   ;;  %v144_v24 = vld [vmem:[#allocation2] sm:$0x1] }
 0x1d0   :  { %v145_v25 = vmul.f32 0.03125, %v144_v24 }
 0x1d2   :  { %151 = vperm.xlu1 %188, %v145_v25  }
 0x24a   :  { %v161_v28 = vpop.permute.xlu0 %160 }
 0x24b   :  { %v166_v30 = vrot.slane %v161_v28, %v156_v27 }
 0x24d   :  { %v152_v29 = vpop.permute.xlu1 %151 }
 0x24e   :  { %v157_v31 = vrot.slane %v152_v29, %v156_v27 }
 0x250   :  { %v167_v32 = vsel %vm148_vm11, %v157_v31, %v166_v30 }
 0x251   :  { %169 = vst.msk [vmem:[#allocation4] sm:$0x1] %vm168_vm12, %v167_v32 }
 0x252   :  { %208 = shalt.err (!%p205_p4)
}
 0x253   :  { %179 = dma.vmem_to_hbm [thread:$0]  %s177_s16, 16, %s279_s2, [#allocation5]  }
 0x254   :  { %217 = dma.done.wait [#allocation5], 16  }
 0x255   :  { %218 = vsyncadd [#allocation5], 4294967280 }
 0x256   :  { %183 = vsyncpa [#allocation5], 1 }

</bundles_post_ra>
